<compile_context>
chip_gen: v7x
topology: tpu7x:2x2x1
jax: 0.10.0
libtpu: 0.0.40
codegen_flags: <defaults>
</compile_context>

<pallas_src>
import functools

import jax
import jax.numpy as jnp
from jax.experimental import pallas as pl
from jax.experimental.pallas import tpu as pltpu


def _pad_identity(dtype):
    """Identity element for max that is valid for the given dtype."""
    dtype = jnp.dtype(dtype)
    if jnp.issubdtype(dtype, jnp.floating):
        return -jnp.inf
    if jnp.issubdtype(dtype, jnp.integer):
        return int(jnp.iinfo(dtype).min)
    if dtype == jnp.bool_:
        return False
    raise ValueError(f"unsupported dtype for max pooling: {dtype}")


def _maxpool1d_kernel(x_ref, o_ref, pad_ref, *, kernel_size, stride, padding, t, t_out):
    """x_ref: (C_tile, T) native tile; o_ref: (C_tile, T_out); pad_ref: (T+2p, C_tile)."""
    c_tile = pad_ref.shape[1]
    ident = _pad_identity(pad_ref.dtype)

    # In-VMEM transpose (XLU, otherwise idle) so the pooled axis is on sublanes.
    xt = jnp.transpose(x_ref[...], (1, 0))  # (T, C_tile)

    # Boundary padding folded into the kernel: tiny pad-row writes, no HBM traffic.
    if padding > 0:
        pad_rows = jnp.full((padding, c_tile), ident, dtype=pad_ref.dtype)
        pad_ref[pl.ds(0, padding), :] = pad_rows
        pad_ref[pl.ds(padding + t, padding), :] = pad_rows
    pad_ref[pl.ds(padding, t), :] = xt

    def tap(k):
        # Sublane-strided read of rows k, k+stride, ..., k+(t_out-1)*stride.
        if stride == 1:
            return pad_ref[pl.ds(k, t_out), :]
        return pad_ref[pl.ds(k, t_out, stride=stride), :]

    acc = tap(0)
    for k in range(1, kernel_size):  # small static unroll; pure VPU max
        acc = jnp.maximum(acc, tap(k))

    # Back to native (C_tile, T_out) layout for a direct store to the NCT output.
    o_ref[...] = jnp.transpose(acc, (1, 0))


def _vmem_capacity_bytes():
    try:
        return int(pltpu.get_tpu_info().vmem_capacity_bytes)
    except Exception:
        return 64 << 20  # conservative: v7x per-TC VMEM


def _block_footprint_bytes(tc, t, t_out, padding, itemsize):
    # Double-buffered input + output blocks plus the single-buffered pad scratch.
    return (2 * (t + t_out) + (t + 2 * padding)) * tc * itemsize


def _pick_channel_tile(c, t, t_out, padding, itemsize, budget_bytes):
    """Largest multiple-of-8 divisor of C whose VMEM block footprint fits the budget."""
    if c % 8 != 0:
        return c  # full-dim block is always legal
    best = 8
    for cand in range(8, c + 1, 8):
        if c % cand:
            continue
        if _block_footprint_bytes(cand, t, t_out, padding, itemsize) <= budget_bytes:
            best = cand
    return best


def temporal_maxer(x, kernel_size, stride, padding):
    """MaxPool1d(kernel_size, stride, padding) on x of shape (B, C, T) -> (B, C, T_out)."""
    b, c, t = x.shape
    assert padding <= kernel_size // 2, "PyTorch MaxPool1d requires padding <= kernel_size // 2"
    t_out = (t + 2 * padding - kernel_size) // stride + 1
    assert t_out >= 1, "invalid pooling configuration"

    itemsize = jnp.dtype(x.dtype).itemsize
    capacity = _vmem_capacity_bytes()
    budget = capacity // 4  # 16 MiB on v7x, 32 MiB on v5e/v6e
    tc = _pick_channel_tile(c, t, t_out, padding, itemsize, budget)
    n_ct = c // tc if c % tc == 0 else pl.cdiv(c, tc)

    foot = _block_footprint_bytes(tc, t, t_out, padding, itemsize)
    vmem_limit = int(min(max(foot + (4 << 20), 16 << 20), (3 * capacity) // 4))

    kernel = functools.partial(
        _maxpool1d_kernel,
        kernel_size=kernel_size,
        stride=stride,
        padding=padding,
        t=t,
        t_out=t_out,
    )

    return pl.pallas_call(
        kernel,
        out_shape=jax.ShapeDtypeStruct((b, c, t_out), x.dtype),
        grid_spec=pltpu.PrefetchScalarGridSpec(
            num_scalar_prefetch=0,
            grid=(b, n_ct),
            in_specs=[
                pl.BlockSpec((pl.Squeezed(), tc, t), lambda i, j: (i, j, 0)),
            ],
            out_specs=pl.BlockSpec((pl.Squeezed(), tc, t_out), lambda i, j: (i, j, 0)),
            scratch_shapes=[pltpu.VMEM((t + 2 * padding, tc), x.dtype)],
        ),
        compiler_params=pltpu.CompilerParams(
            dimension_semantics=("parallel", "parallel"),
            vmem_limit_bytes=vmem_limit,
        ),
    )(x)


def _reference_maxpool1d(x, kernel_size, stride, padding):
    """Pure-JAX reference mirroring torch.nn.MaxPool1d semantics (ceil_mode=False)."""
    b, c, t = x.shape
    t_out = (t + 2 * padding - kernel_size) // stride + 1
    xp = jnp.pad(
        x,
        ((0, 0), (0, 0), (padding, padding)),
        constant_values=_pad_identity(x.dtype),
    )
    taps = [
        xp[:, :, k : k + (t_out - 1) * stride + 1 : stride]
        for k in range(kernel_size)
    ]
    return functools.reduce(jnp.maximum, taps)


def _check(x, kernel_size, stride, padding):
    out = jax.block_until_ready(temporal_maxer(x, kernel_size, stride, padding))
    ref = _reference_maxpool1d(x, kernel_size, stride, padding)
    assert out.shape == ref.shape, (out.shape, ref.shape)
    assert jnp.allclose(out, ref), "Pallas output mismatch vs reference"


if __name__ == "__main__":
    key = jax.random.PRNGKey(0)

    # TemporalMaxer(kernel_size=3, stride=2, padding=1, n_embd=32)
    # (MaxPool1d has no learnable parameters; n_embd only fixes channel count.)
    B, C, T = 2, 32, 16
    x = jax.random.normal(key, (B, C, T), dtype=jnp.float32)
    _check(x, kernel_size=3, stride=2, padding=1)

    # stride == 1 code path on the same small shape.
    _check(x, kernel_size=3, stride=1, padding=1)

    # Slightly larger, non-trivial (T, C) combo exercising the channel-sublane tiling.
    k2 = jax.random.PRNGKey(1)
    x2 = jax.random.normal(k2, (2, 128, 200), dtype=jnp.float32)
    _check(x2, kernel_size=3, stride=2, padding=1)

    print("KERNEL_OK")
</pallas_src>

<mosaic_0001>
module attributes {stable_mosaic.version = 11 : i64} {
  func.func @_maxpool1d_kernel(%arg0: i32, %arg1: i32, %arg2: memref<1x32x16xf32, #tpu.memory_space<vmem>>, %arg3: memref<1x32x8xf32, #tpu.memory_space<vmem>>, %arg4: memref<18x32xf32, #tpu.memory_space<vmem>>) attributes {dimension_semantics = [#tpu.dimension_semantics<parallel>, #tpu.dimension_semantics<parallel>], iteration_bounds = array<i64: 2, 1>, scalar_prefetch = 0 : i64, scratch_operands = 1 : i64, tpu.core_type = #tpu.core_type<tc>, window_params = [{transform_indices = @transform_0, window_bounds = array<i64: 1, 32, 16>}, {transform_indices = @transform_1, window_bounds = array<i64: 1, 32, 8>}]} {
    %c0 = arith.constant 0 : index
    %c0_0 = arith.constant 0 : index
    %c0_1 = arith.constant 0 : index
    %0 = vector.load %arg2[%c0, %c0_0, %c0_1] : memref<1x32x16xf32, #tpu.memory_space<vmem>>, vector<1x32x16xf32>
    %1 = vector.shape_cast %0 : vector<1x32x16xf32> to vector<32x16xf32>
    %2 = tpu.transpose %1, [1, 0] : vector<32x16xf32> -> vector<16x32xf32>
    %cst = arith.constant 0xFF800000 : f32
    %3 = vector.broadcast %cst : f32 to vector<1x32xf32>
    %c0_2 = arith.constant 0 : index
    %c0_3 = arith.constant 0 : index
    %4 = vector.load %arg4[%c0_2, %c0_3] : memref<18x32xf32, #tpu.memory_space<vmem>>, vector<1x32xf32>
    tpu.vector_store %arg4[%c0_2, %c0_3], %3 {strides = array<i32>} : memref<18x32xf32, #tpu.memory_space<vmem>>, vector<1x32xf32>,
    %c17 = arith.constant 17 : index
    %c0_4 = arith.constant 0 : index
    %5 = vector.load %arg4[%c17, %c0_4] : memref<18x32xf32, #tpu.memory_space<vmem>>, vector<1x32xf32>
    tpu.vector_store %arg4[%c17, %c0_4], %3 {strides = array<i32>} : memref<18x32xf32, #tpu.memory_space<vmem>>, vector<1x32xf32>,
    %c1 = arith.constant 1 : index
    %c0_5 = arith.constant 0 : index
    %6 = vector.load %arg4[%c1, %c0_5] : memref<18x32xf32, #tpu.memory_space<vmem>>, vector<16x32xf32>
    tpu.vector_store %arg4[%c1, %c0_5], %2 {strides = array<i32>} : memref<18x32xf32, #tpu.memory_space<vmem>>, vector<16x32xf32>,
    %c0_6 = arith.constant 0 : index
    %c0_7 = arith.constant 0 : index
    %7 = tpu.strided_load %arg4[%c0_6, %c0_7] {strides = array<i32: 2, 1>} : memref<18x32xf32, #tpu.memory_space<vmem>>, vector<8x32xf32>
    %c1_8 = arith.constant 1 : index
    %c0_9 = arith.constant 0 : index
    %8 = tpu.strided_load %arg4[%c1_8, %c0_9] {strides = array<i32: 2, 1>} : memref<18x32xf32, #tpu.memory_space<vmem>>, vector<8x32xf32>
    %9 = arith.maximumf %7, %8 : vector<8x32xf32>
    %c2 = arith.constant 2 : index
    %c0_10 = arith.constant 0 : index
    %10 = tpu.strided_load %arg4[%c2, %c0_10] {strides = array<i32: 2, 1>} : memref<18x32xf32, #tpu.memory_space<vmem>>, vector<8x32xf32>
    %11 = arith.maximumf %9, %10 : vector<8x32xf32>
    %12 = tpu.transpose %11, [1, 0] : vector<8x32xf32> -> vector<32x8xf32>
    %c0_11 = arith.constant 0 : index
    %c0_12 = arith.constant 0 : index
    %c0_13 = arith.constant 0 : index
    %13 = vector.load %arg3[%c0_11, %c0_12, %c0_13] : memref<1x32x8xf32, #tpu.memory_space<vmem>>, vector<1x32x8xf32>
    %14 = vector.shape_cast %13 : vector<1x32x8xf32> to vector<32x8xf32>
    %15 = vector.shape_cast %12 : vector<32x8xf32> to vector<1x32x8xf32>
    tpu.vector_store %arg3[%c0_11, %c0_12, %c0_13], %15 {strides = array<i32>} : memref<1x32x8xf32, #tpu.memory_space<vmem>>, vector<1x32x8xf32>,
    return
  }
  func.func @transform_0(%arg0: i32, %arg1: i32) -> (i32, i32, i32) {
    %c0_i32 = arith.constant 0 : i32
    %c0_i32_0 = arith.constant 0 : i32
    return %arg0, %arg1, %c0_i32 : i32, i32, i32
  }
  func.func @transform_1(%arg0: i32, %arg1: i32) -> (i32, i32, i32) {
    %c0_i32 = arith.constant 0 : i32
    %c0_i32_0 = arith.constant 0 : i32
    return %arg0, %arg1, %c0_i32 : i32, i32, i32
  }
}

</mosaic_0001>

<bundles_post_ra>
// kernel: tpu_custom_call.1
= control target key start
LH: loop header
LB: loop body
LE: loop exit
PB: predicated region body
PF: predicated region fallthrough
CT: control target
= control target key end

     0   :  { %s403_s6 = smov 0   ;;  %s405_s7 = smov 0   ;;  %s436_s0 = inlined_call_operand.vmem [shape: f32[2,32,16], index: 0, kind: input, shape index: {}]   ;;  %s437_s1 = inlined_call_operand.vmem [shape: f32[2,32,8], index: 1, kind: output, shape index: {}]  }
   0x1   :  { %s407_s8 = smov 0  }
   0x2 LB: > { %s23_s9 = sadd.s32 1, %s386_s7  ;;  %p333_p0 = scmp.ge.s32.totalorder %s390_s8, 1  ;;  %s390_s8 = sphi %s407_s8, %s11_s8   ;;  %s386_s7 = sphi %s405_s7, %s439_s7   ;;  %s382_s6 = sphi %s403_s6, %s438_s6  }
   0x3   : > { %p25_p1 = scmp.ge.s32.totalorder %s23_s9, 2  ;;  %p108_p2 = scmp.lt.s32.totalorder %s390_s8, 3 }
   0x5   : > { %s441_s9 = smov (%p25_p1, %s23_s9), 0  ;;  %p109_p3 = pnand %p333_p0, %p108_p2 }
   0x6   : > { %p137_p4 = scmp.lt.s32.totalorder (!%p109_p3), %s382_s6, 1  ;;  %vm192_vm0 = vcmask (!%p109_p3), 253952   ;;  %v392_v3 = vmov (!%p109_p3), -inf   ;;  %vm195_vm1 = vcmask (!%p109_p3), 261120   ;;  %vm237_vm2 = vcmask (!%p109_p3), 64512  }
   0x7   : > { %112 = sbr.rel (%p109_p3) target bundleno = 305 (0x131), region = 24  ;;  %193 = vst.msk [vmem:[#allocation2] sm:$0x1] (!%p109_p3), %vm192_vm0, %v392_v3 }
   0xe   : > { %s443_s6 = smov (!%p137_p4, %s382_s6), 1 }
   0xf   : > { %s340_s10 = sshll.u32 %s443_s6, 5 }
  0x10   : > { %s144_s13 = scalar_lea.vmem %s436_s0, %s340_s10  ;;  %s154_s16 = scalar_lea.vmem %s437_s1, %s340_s10 }
  0x11   : > { %v156_v0 = vld [vmem:[%s144_s13] sm:$0xff]  ;;  %v157_v1 = vld [vmem:[%s144_s13 + $0x8] sm:$0xff]  ;;  %v158_v2 = vld [vmem:[%s144_s13 + $0x10] sm:$0xff] }
  0x12   : > { %160 = vxpose.xlu0.b32.start [1/4] (short) (narrow) %v156_v0, 16  ;;  %v159_v4 = vld [vmem:[%s144_s13 + $0x18] sm:$0xff] }
  0x16   : > { %161 = vxpose.xlu0.b32.cont [2/4] (short) (narrow) %v157_v1, 16 }
  0x1a   : > { %162 = vxpose.xlu0.b32.cont [3/4] (short) (narrow) %v158_v2, 16 }
  0x1e   : > { %163 = vxpose.xlu0.b32.end [4/4] (short) (narrow) %v159_v4, 16 }
  0x92   : > { %v176_v5 = vpop.trf.xlu0 }
  0x93   : > { %196 = vst.msk [vmem:[#allocation2 + $0x1] sm:$0xff] %vm195_vm1, %v176_v5 }
  0x96   : > { %v177_v6 = vpop.trf.xlu0 }
  0x97   : > { %197 = vst.msk [vmem:[#allocation2 + $0x9] sm:$0xff] %vm195_vm1, %v177_v6 }
  0x9e   : > { %v198_v7 = vld [vmem:[#allocation2] ss:$2 sm:$0xff]  ;;  %v200_v8 = vld [vmem:[#allocation2 + $0x1] ss:$2 sm:$0xff] }
  0x9f   : > { %v201_v9 = vmax.f32 %v198_v7, %v200_v8  ;;  %v203_v10 = vld [vmem:[#allocation2 + $0x2] ss:$2 sm:$0xff] }
  0xa1   : > { %v204_v11 = vmax.f32 %v201_v9, %v203_v10 }
  0xa3   : > { %205 = vxpose.xlu1.b32.start.end [1/1] (short) (narrow) %v204_v11, 32 }
 0x123   : > { %v221_v12 = vpop.trf.xlu1 }
 0x124   : > { %238 = vst.msk [vmem:[%s154_s16] sm:$0xff] %vm237_vm2, %v221_v12 }
 0x127   : > { %v222_v13 = vpop.trf.xlu1 }
 0x128   : > { %239 = vst.msk [vmem:[%s154_s16 + $0x8] sm:$0xff] %vm237_vm2, %v222_v13 }
 0x12b   : > { %v223_v14 = vpop.trf.xlu1 }
 0x12c   : > { %240 = vst.msk [vmem:[%s154_s16 + $0x10] sm:$0xff] %vm237_vm2, %v223_v14 }
 0x12f   : > { %v224_v15 = vpop.trf.xlu1 }
 0x130   : > { %241 = vst.msk [vmem:[%s154_s16 + $0x18] sm:$0xff] %vm237_vm2, %v224_v15 }
 0x131 PF: > { %s11_s8 = sadd.s32 1, %s390_s8   ;;  %s438_s6 = smov %s386_s7 }
 0x132   : > { %p8_p5 = scmp.ge.s32.totalorder %s11_s8, 4   ;;  %s439_s7 = smov %s441_s9 }
 0x134   :  { %10 = sbr.rel (!%p8_p5) target bundleno = 2 (0x2), region = 56 }

</bundles_post_ra>
